<compile_context>
chip_gen: v5e
topology: v5e:2x2
jax: 0.10.0
libtpu: 0.0.40
codegen_flags: <defaults>
</compile_context>

<pallas_src>
import functools

import jax
import jax.numpy as jnp
import numpy as np
from jax import lax
from jax.experimental import pallas as pl
from jax.experimental.pallas import tpu as pltpu


# ----------------------------- Pallas kernels ------------------------------ #

def _deconv_stats_kernel(p_ref, w_ref, y_ref, sum_ref, sq_ref):
    # p_ref:   (Ktap, TS)   bf16  phase-decomposed im2col patches (lane-dense)
    # w_ref:   (Cout, Ktap) bf16  this phase's sub-kernel
    # y_ref:   (Cout, TS)   bf16  conv output tile (bf16 intermediate)
    # sum_ref: (Cout, 1)    f32   per-(phase, channel) running sum   (resident)
    # sq_ref:  (Cout, 1)    f32   per-(phase, channel) running sumsq (resident)
    sp = pl.program_id(1)

    @pl.when(sp == 0)
    def _():
        sum_ref[...] = jnp.zeros_like(sum_ref)
        sq_ref[...] = jnp.zeros_like(sq_ref)

    z = jnp.dot(w_ref[...], p_ref[...], preferred_element_type=jnp.float32)
    y_ref[...] = z.astype(y_ref.dtype)
    sum_ref[...] += jnp.sum(z, axis=1, keepdims=True)
    sq_ref[...] += jnp.sum(z * z, axis=1, keepdims=True)


def _bn_apply_kernel(y_ref, scale_ref, shift_ref, o_ref):
    # y_ref: (Cout, TS) bf16; scale/shift: (Cout, 1) f32; o_ref: (Cout, TS) f32
    o_ref[...] = y_ref[...].astype(jnp.float32) * scale_ref[...] + shift_ref[...]


# ------------------------------- Wrapper ----------------------------------- #

def deconv2d_batchnorm(x, weight_t, bias, gamma, beta, *, stride, padding,
                       eps=1e-5, ts=4096):
    """x: [N, Cin, H, W]; weight_t: [Cin, Cout, Kh, Kw] (ConvTranspose2d layout)."""
    del bias  # per-channel conv bias cancels exactly under training-mode BN
    N, Cin, H, W = x.shape
    _, Cout, Kh, Kw = weight_t.shape
    s, p = stride, padding
    Ho = (H - 1) * s - 2 * p + Kh
    Wo = (W - 1) * s - 2 * p + Kw

    # Stride-phase decomposition: output (oh, ow) with oh = s*oh' + a only sees
    # taps kh == (a+p) mod s, reading input rows ih = oh' + (a+p)//s - j.
    Jh, Jw = -(-Kh // s), -(-Kw // s)          # sub-kernel extent per phase
    Hop, Wop = -(-Ho // s), -(-Wo // s)        # per-phase output extent
    Ktap = Jh * Jw * Cin
    P = s * s

    q = [(a + p) // s for a in range(s)]
    pad_lo_h = max(max(0, (Jh - 1) - q[a]) for a in range(s))
    pad_hi_h = max(max(0, (Hop - 1) + q[a] - (H - 1)) for a in range(s))
    pad_lo_w = max(max(0, (Jw - 1) - q[b]) for b in range(s))
    pad_hi_w = max(max(0, (Wop - 1) + q[b] - (W - 1)) for b in range(s))

    xb = x.astype(jnp.bfloat16)                 # cast BEFORE the gather glue
    x_pad = jnp.pad(xb, ((0, 0), (0, 0),
                         (pad_lo_h, pad_hi_h), (pad_lo_w, pad_hi_w)))

    # Lane-dense tiling of the merged (batch, per-phase pixel) axis.
    assert ts % 128 == 0
    L = N * Hop * Wop
    if L <= ts:
        TS = ((L + 127) // 128) * 128
        Lp = TS
    else:
        TS = ts
        Lp = ((L + TS - 1) // TS) * TS
    n_sp = Lp // TS

    patch_list, w_list = [], []
    for a in range(s):
        cnt_h = (Ho - a + s - 1) // s
        for b in range(s):
            cnt_w = (Wo - b + s - 1) // s
            # Out-of-range phase pixels (when Ho/Wo % s != 0) must stay exactly
            # zero so they don't pollute sum/sumsq (count uses the true N*Ho*Wo).
            mask = ((jnp.arange(Hop) < cnt_h)[:, None]
                    & (jnp.arange(Wop) < cnt_w)[None, :])
            taps = []
            w_ab = jnp.zeros((Cout, Jh, Jw, Cin), jnp.float32)
            for th in range(Jh):
                kh = ((a + p) % s) + s * (Jh - 1 - th)
                r0 = pad_lo_h + q[a] - (Jh - 1) + th
                for tw in range(Jw):
                    kw = ((b + p) % s) + s * (Jw - 1 - tw)
                    c0 = pad_lo_w + q[b] - (Jw - 1) + tw
                    taps.append(x_pad[:, :, r0:r0 + Hop, c0:c0 + Wop])
                    if kh < Kh and kw < Kw:
                        w_ab = w_ab.at[:, th, tw, :].set(weight_t[:, :, kh, kw].T)
            pk = jnp.stack(taps, axis=1)                    # (N, Jh*Jw, Cin, Hop, Wop)
            pk = jnp.where(mask, pk, 0)
            pk = pk.reshape(N, Ktap, Hop * Wop)
            pk = jnp.transpose(pk, (1, 0, 2)).reshape(Ktap, L)
            patch_list.append(pk)
            w_list.append(w_ab.reshape(Cout, Ktap))

    patches = jnp.stack(patch_list, axis=0)                 # (P, Ktap, L) bf16
    patches = jnp.pad(patches, ((0, 0), (0, 0), (0, Lp - L)))
    w_sub = jnp.stack(w_list, axis=0).astype(jnp.bfloat16)  # (P, Cout, Ktap)

    # --- pass 1: per-phase deconv matmul + fused BN statistics --- #
    y_p, csum, csq = pl.pallas_call(
        _deconv_stats_kernel,
        grid=(P, n_sp),
        in_specs=[
            pl.BlockSpec((None, Ktap, TS), lambda g, t: (g, 0, t)),
            pl.BlockSpec((None, Cout, Ktap), lambda g, t: (g, 0, 0)),
        ],
        out_specs=[
            pl.BlockSpec((None, Cout, TS), lambda g, t: (g, 0, t)),
            pl.BlockSpec((None, Cout, 1), lambda g, t: (g, 0, 0)),
            pl.BlockSpec((None, Cout, 1), lambda g, t: (g, 0, 0)),
        ],
        out_shape=(
            jax.ShapeDtypeStruct((P, Cout, Lp), jnp.bfloat16),
            jax.ShapeDtypeStruct((P, Cout, 1), jnp.float32),
            jax.ShapeDtypeStruct((P, Cout, 1), jnp.float32),
        ),
        compiler_params=pltpu.CompilerParams(
            dimension_semantics=("parallel", "arbitrary")),
    )(patches, w_sub)

    # --- tiny (Cout,)-sized reduction between the calls: scale/shift once --- #
    count = float(N * Ho * Wo)          # masked / padded lanes are exact zeros
    total = jnp.sum(csum, axis=0)[:, 0]
    total_sq = jnp.sum(csq, axis=0)[:, 0]
    mean = total / count
    var = total_sq / count - mean * mean          # biased variance (PyTorch BN fwd)
    scale = gamma * lax.rsqrt(var + eps)
    shift = beta - mean * scale

    # --- pass 2: tiled, fully-parallel fused multiply-add --- #
    out_p = pl.pallas_call(
        _bn_apply_kernel,
        grid=(P, n_sp),
        in_specs=[
            pl.BlockSpec((None, Cout, TS), lambda g, t: (g, 0, t)),
            pl.BlockSpec((Cout, 1), lambda g, t: (0, 0)),
            pl.BlockSpec((Cout, 1), lambda g, t: (0, 0)),
        ],
        out_specs=pl.BlockSpec((None, Cout, TS), lambda g, t: (g, 0, t)),
        out_shape=jax.ShapeDtypeStruct((P, Cout, Lp), jnp.float32),
        compiler_params=pltpu.CompilerParams(
            dimension_semantics=("parallel", "parallel")),
    )(y_p, scale.reshape(Cout, 1), shift.reshape(Cout, 1))

    # Re-interleave the s*s phases back into NCHW (pure reshape after the
    # transpose; out-of-range phase pixels are sliced away here).
    yph = out_p[:, :, :L].reshape(s, s, Cout, N, Hop, Wop)
    out = jnp.transpose(yph, (3, 2, 4, 0, 5, 1)).reshape(N, Cout, Hop * s, Wop * s)
    return out[:, :, :Ho, :Wo]


# ----------------------------- Pure-JAX reference --------------------------- #

def reference(x, weight_t, bias, gamma, beta, *, stride, padding, eps=1e-5):
    Cout = weight_t.shape[1]
    k = weight_t.shape[2]
    w_conv = jnp.transpose(weight_t, (1, 0, 2, 3))[:, :, ::-1, ::-1]  # OIHW
    pp = k - 1 - padding
    y = lax.conv_general_dilated(
        x, w_conv, window_strides=(1, 1),
        padding=[(pp, pp), (pp, pp)],
        lhs_dilation=(stride, stride),
        dimension_numbers=("NCHW", "OIHW", "NCHW"),
    ) + bias.reshape(1, Cout, 1, 1)
    mean = y.mean(axis=(0, 2, 3), keepdims=True)
    var = y.var(axis=(0, 2, 3), keepdims=True)  # biased, like PyTorch BN fwd
    return (y - mean) / jnp.sqrt(var + eps) * gamma.reshape(1, Cout, 1, 1) \
        + beta.reshape(1, Cout, 1, 1)


# --------------------------------- Main ------------------------------------ #

if __name__ == "__main__":
    # deconv2DBatchNorm(in_channels=4, n_filters=4, k_size=3, stride=2,
    # padding=1, bias=True), training-mode BatchNorm.
    N, Cin, H, W = 2, 4, 16, 16
    Cout, K, STRIDE, PAD = 4, 3, 2, 1

    key = jax.random.PRNGKey(0)
    kx, kw, kb = jax.random.split(key, 3)

    x = jax.random.normal(kx, (N, Cin, H, W), jnp.float32)
    weight_t = 0.1 * jax.random.normal(kw, (Cin, Cout, K, K), jnp.float32)
    bias = 0.1 * jax.random.normal(kb, (Cout,), jnp.float32)
    gamma = jnp.ones((Cout,), jnp.float32)   # PyTorch BatchNorm2d default init
    beta = jnp.zeros((Cout,), jnp.float32)

    out = deconv2d_batchnorm(x, weight_t, bias, gamma, beta,
                             stride=STRIDE, padding=PAD)
    out = jax.block_until_ready(out)

    ref = reference(x, weight_t, bias, gamma, beta, stride=STRIDE, padding=PAD)
    np.testing.assert_allclose(np.asarray(out), np.asarray(ref),
                               rtol=5e-2, atol=5e-2)

    print("KERNEL_OK")
</pallas_src>

<mosaic_0001>
module attributes {stable_mosaic.version = 11 : i64} {
  func.func @_deconv_stats_kernel(%arg0: i32, %arg1: i32, %arg2: memref<1x16x512xbf16, #tpu.memory_space<vmem>>, %arg3: memref<1x4x16xbf16, #tpu.memory_space<vmem>>, %arg4: memref<1x4x512xbf16, #tpu.memory_space<vmem>>, %arg5: memref<1x4x1xf32, #tpu.memory_space<vmem>>, %arg6: memref<1x4x1xf32, #tpu.memory_space<vmem>>) attributes {dimension_semantics = [#tpu.dimension_semantics<parallel>, #tpu.dimension_semantics<arbitrary>], iteration_bounds = array<i64: 4, 1>, scalar_prefetch = 0 : i64, scratch_operands = 0 : i64, tpu.core_type = #tpu.core_type<tc>, window_params = [{transform_indices = @transform_0, window_bounds = array<i64: 1, 16, 512>}, {transform_indices = @transform_1, window_bounds = array<i64: 1, 4, 16>}, {transform_indices = @transform_2, window_bounds = array<i64: 1, 4, 512>}, {transform_indices = @transform_3, window_bounds = array<i64: 1, 4, 1>}, {transform_indices = @transform_4, window_bounds = array<i64: 1, 4, 1>}]} {
    %c0_i32 = arith.constant 0 : i32
    %0 = arith.cmpi eq, %arg1, %c0_i32 : i32
    %1 = arith.extui %0 : i1 to i32
    %c0_i32_0 = arith.constant 0 : i32
    %2 = arith.cmpi ne, %1, %c0_i32_0 : i32
    scf.if %2 {
      %cst_23 = arith.constant 0.000000e+00 : f32
      %29 = vector.broadcast %cst_23 : f32 to vector<4x1xf32>
      %c0_24 = arith.constant 0 : index
      %c0_25 = arith.constant 0 : index
      %c0_26 = arith.constant 0 : index
      %30 = vector.load %arg5[%c0_24, %c0_25, %c0_26] : memref<1x4x1xf32, #tpu.memory_space<vmem>>, vector<1x4x1xf32>
      %31 = vector.shape_cast %30 : vector<1x4x1xf32> to vector<4x1xf32>
      %32 = vector.shape_cast %29 : vector<4x1xf32> to vector<1x4x1xf32>
      tpu.vector_store %arg5[%c0_24, %c0_25, %c0_26], %32 {strides = array<i32>} : memref<1x4x1xf32, #tpu.memory_space<vmem>>, vector<1x4x1xf32>,
      %cst_27 = arith.constant 0.000000e+00 : f32
      %33 = vector.broadcast %cst_27 : f32 to vector<4x1xf32>
      %c0_28 = arith.constant 0 : index
      %c0_29 = arith.constant 0 : index
      %c0_30 = arith.constant 0 : index
      %34 = vector.load %arg6[%c0_28, %c0_29, %c0_30] : memref<1x4x1xf32, #tpu.memory_space<vmem>>, vector<1x4x1xf32>
      %35 = vector.shape_cast %34 : vector<1x4x1xf32> to vector<4x1xf32>
      %36 = vector.shape_cast %33 : vector<4x1xf32> to vector<1x4x1xf32>
      tpu.vector_store %arg6[%c0_28, %c0_29, %c0_30], %36 {strides = array<i32>} : memref<1x4x1xf32, #tpu.memory_space<vmem>>, vector<1x4x1xf32>,
    } else {
    }
    %c0 = arith.constant 0 : index
    %c0_1 = arith.constant 0 : index
    %c0_2 = arith.constant 0 : index
    %3 = vector.load %arg3[%c0, %c0_1, %c0_2] : memref<1x4x16xbf16, #tpu.memory_space<vmem>>, vector<1x4x16xbf16>
    %4 = vector.shape_cast %3 : vector<1x4x16xbf16> to vector<4x16xbf16>
    %c0_3 = arith.constant 0 : index
    %c0_4 = arith.constant 0 : index
    %c0_5 = arith.constant 0 : index
    %5 = vector.load %arg2[%c0_3, %c0_4, %c0_5] : memref<1x16x512xbf16, #tpu.memory_space<vmem>>, vector<1x16x512xbf16>
    %6 = vector.shape_cast %5 : vector<1x16x512xbf16> to vector<16x512xbf16>
    %cst = arith.constant dense<0.000000e+00> : vector<4x512xf32>
    %7 = tpu.matmul %4, %6, %cst {dimension_numbers = #tpu.dot_dimension_numbers<[1], [0], [0], [1], [0, 0, 1, 1], [], []>} : vector<4x16xbf16>, vector<16x512xbf16>, vector<4x512xf32> -> vector<4x512xf32>
    %8 = arith.truncf %7 : vector<4x512xf32> to vector<4x512xbf16>
    %c0_6 = arith.constant 0 : index
    %c0_7 = arith.constant 0 : index
    %c0_8 = arith.constant 0 : index
    %9 = vector.load %arg4[%c0_6, %c0_7, %c0_8] : memref<1x4x512xbf16, #tpu.memory_space<vmem>>, vector<1x4x512xbf16>
    %10 = vector.shape_cast %9 : vector<1x4x512xbf16> to vector<4x512xbf16>
    %11 = vector.shape_cast %8 : vector<4x512xbf16> to vector<1x4x512xbf16>
    tpu.vector_store %arg4[%c0_6, %c0_7, %c0_8], %11 {strides = array<i32>} : memref<1x4x512xbf16, #tpu.memory_space<vmem>>, vector<1x4x512xbf16>,
    %c0_9 = arith.constant 0 : index
    %c0_10 = arith.constant 0 : index
    %c0_11 = arith.constant 0 : index
    %12 = vector.load %arg5[%c0_9, %c0_10, %c0_11] : memref<1x4x1xf32, #tpu.memory_space<vmem>>, vector<1x4x1xf32>
    %13 = vector.shape_cast %12 : vector<1x4x1xf32> to vector<4x1xf32>
    %cst_12 = arith.constant dense<0.000000e+00> : vector<4xf32>
    %14 = vector.multi_reduction <add>, %7, %cst_12 [1] : vector<4x512xf32> to vector<4xf32>
    %15 = vector.shape_cast %14 : vector<4xf32> to vector<4x1xf32>
    %16 = arith.addf %13, %15 : vector<4x1xf32>
    %c0_13 = arith.constant 0 : index
    %c0_14 = arith.constant 0 : index
    %c0_15 = arith.constant 0 : index
    %17 = vector.load %arg5[%c0_13, %c0_14, %c0_15] : memref<1x4x1xf32, #tpu.memory_space<vmem>>, vector<1x4x1xf32>
    %18 = vector.shape_cast %17 : vector<1x4x1xf32> to vector<4x1xf32>
    %19 = vector.shape_cast %16 : vector<4x1xf32> to vector<1x4x1xf32>
    tpu.vector_store %arg5[%c0_13, %c0_14, %c0_15], %19 {strides = array<i32>} : memref<1x4x1xf32, #tpu.memory_space<vmem>>, vector<1x4x1xf32>,
    %c0_16 = arith.constant 0 : index
    %c0_17 = arith.constant 0 : index
    %c0_18 = arith.constant 0 : index
    %20 = vector.load %arg6[%c0_16, %c0_17, %c0_18] : memref<1x4x1xf32, #tpu.memory_space<vmem>>, vector<1x4x1xf32>
    %21 = vector.shape_cast %20 : vector<1x4x1xf32> to vector<4x1xf32>
    %22 = arith.mulf %7, %7 : vector<4x512xf32>
    %cst_19 = arith.constant dense<0.000000e+00> : vector<4xf32>
    %23 = vector.multi_reduction <add>, %22, %cst_19 [1] : vector<4x512xf32> to vector<4xf32>
    %24 = vector.shape_cast %23 : vector<4xf32> to vector<4x1xf32>
    %25 = arith.addf %21, %24 : vector<4x1xf32>
    %c0_20 = arith.constant 0 : index
    %c0_21 = arith.constant 0 : index
    %c0_22 = arith.constant 0 : index
    %26 = vector.load %arg6[%c0_20, %c0_21, %c0_22] : memref<1x4x1xf32, #tpu.memory_space<vmem>>, vector<1x4x1xf32>
    %27 = vector.shape_cast %26 : vector<1x4x1xf32> to vector<4x1xf32>
    %28 = vector.shape_cast %25 : vector<4x1xf32> to vector<1x4x1xf32>
    tpu.vector_store %arg6[%c0_20, %c0_21, %c0_22], %28 {strides = array<i32>} : memref<1x4x1xf32, #tpu.memory_space<vmem>>, vector<1x4x1xf32>,
    return
  }
  func.func @transform_0(%arg0: i32, %arg1: i32) -> (i32, i32, i32) {
    %c0_i32 = arith.constant 0 : i32
    %c0_i32_0 = arith.constant 0 : i32
    return %arg0, %c0_i32, %arg1 : i32, i32, i32
  }
  func.func @transform_1(%arg0: i32, %arg1: i32) -> (i32, i32, i32) {
    %c0_i32 = arith.constant 0 : i32
    %c0_i32_0 = arith.constant 0 : i32
    %c0_i32_1 = arith.constant 0 : i32
    return %arg0, %c0_i32, %c0_i32_0 : i32, i32, i32
  }
  func.func @transform_2(%arg0: i32, %arg1: i32) -> (i32, i32, i32) {
    %c0_i32 = arith.constant 0 : i32
    %c0_i32_0 = arith.constant 0 : i32
    return %arg0, %c0_i32, %arg1 : i32, i32, i32
  }
  func.func @transform_3(%arg0: i32, %arg1: i32) -> (i32, i32, i32) {
    %c0_i32 = arith.constant 0 : i32
    %c0_i32_0 = arith.constant 0 : i32
    %c0_i32_1 = arith.constant 0 : i32
    return %arg0, %c0_i32, %c0_i32_0 : i32, i32, i32
  }
  func.func @transform_4(%arg0: i32, %arg1: i32) -> (i32, i32, i32) {
    %c0_i32 = arith.constant 0 : i32
    %c0_i32_0 = arith.constant 0 : i32
    %c0_i32_1 = arith.constant 0 : i32
    return %arg0, %c0_i32, %c0_i32_0 : i32, i32, i32
  }
}

</mosaic_0001>

<bundles_post_ra>
// kernel: tpu_custom_call.1
= control target key start
LH: loop header
LB: loop body
LE: loop exit
PB: predicated region body
PF: predicated region fallthrough
CT: control target
= control target key end

     0   :  { %s1083_s0 = inlined_call_operand.hbm [shape: bf16[4,16,512], index: 0, kind: input, shape index: {}]   ;;  %s1084_s1 = inlined_call_operand.hbm [shape: bf16[4,4,16], index: 1, kind: input, shape index: {}]   ;;  %s1085_s2 = inlined_call_operand.hbm [shape: bf16[4,4,512], index: 2, kind: output, shape index: {0}]   ;;  %s1086_s3 = inlined_call_operand.vmem [shape: f32[4,4,1], index: 3, kind: output, shape index: {1}]   ;;  %s1087_s4 = inlined_call_operand.vmem [shape: f32[4,4,1], index: 4, kind: output, shape index: {2}]  }
   0x1   :  { %1088 = sst [smem:[#allocation11_spill]] %s1083_s0 }
   0x2   :  { %10 = vsyncpa [#allocation3], 0 }
   0x3   :  { %12 = vsyncpa [#allocation3 + $0x1], 0 }
   0x4   :  { %13 = vsyncpa [#allocation6], 0 }
   0x5   :  { %15 = vsyncpa [#allocation6 + $0x1], 0 }
   0x6   :  { %16 = vsyncpa [#allocation4], 0 }
   0x7   :  { %18 = vsyncpa [#allocation4 + $0x1], 0  ;;  %s915_s15 = smov 0   ;;  %s917_s16 = smov 0  }
   0x8   :  { %s919_s17 = smov 0   ;;  %s921_s18 = smov 0  }
   0x9   :  { %s923_s19 = smov 0   ;;  %s925_s20 = smov 0  }
   0xa LB: > { %s623_s21 = sadd.s32 4294967295, %s885_s20   ;;  %s624_s22 = sadd.s32 4294967294, %s885_s20   ;;  %s885_s20 = sphi %s925_s20, %s24_s20   ;;  %s881_s19 = sphi %s923_s19, %s1099_s19   ;;  %s877_s18 = sphi %s921_s18, %s1098_s18   ;;  %s873_s17 = sphi %s919_s17, %s1097_s17   ;;  %s869_s16 = sphi %s917_s16, %s1096_s16   ;;  %s865_s15 = sphi %s915_s15, %s1095_s15  }
   0xb   : > { %s36_s23 = sadd.s32 1, %s881_s19  ;;  %s45_s24 = sadd.s32 1, %s873_s17 }
   0xc   : > { %p38_p0 = scmp.ge.s32.totalorder %s36_s23, 4  ;;  %p52_p1 = scmp.ne.s32.totalorder %s873_s17, %s869_s16 }
   0xd   : > { %p53_p2 = scmp.eq.s32.totalorder %s885_s20, 0  ;;  %p58_p3 = scmp.ne.s32.totalorder %s869_s16, %s865_s15 }
   0xe   : > { %s1101_s23 = smov (%p38_p0, %s36_s23), 0  ;;  %p59_p5 = scmp.eq.s32.totalorder %s623_s21, 0 }
   0xf   : > { %p956_p4 = por %p53_p2, %p52_p1  ;;  %s40_s26 = ssub.s32 %s881_s19, %s1101_s23 }
  0x10   : > { %p110_p6 = scmp.eq.s32.totalorder %s623_s21, 3  ;;  %p43_p7 = scmp.eq.s32.totalorder %s40_s26, 0 }
  0x11   : > { %p962_p8 = por %p59_p5, %p58_p3  ;;  %p116_p10 = scmp.eq.s32.totalorder %s624_s22, 3 }
  0x12   : > { %p966_p9 = por %p110_p6, %p52_p1  ;;  %p686_p12 = scmp.lt.s32.totalorder %s885_s20, 4 }
  0x13   : > { %s971_s29 = scalar_select %p43_p7, %s873_s17, %s45_s24  }
  0x14   : > { %p973_p11 = por %p116_p10, %p58_p3  ;;  %s188_s5 = sand.u32 1, %s873_s17  }
  0x15   : > { %s627_s6 = sshll.u32 %s188_s5, 5  ;;  %s663_s7 = sshll.u32 %s881_s19, 5 }
  0x16   : > { %s1093_s0 = sld [smem:[#allocation11_spill]]  ;;  %s192_s11 = scalar_lea.vmem [#allocation2], %s627_s6 }
  0x17   : > { %s202_s12 = sshll.u32 %s192_s11, 4  ;;  %p985_p13 = pnand %p686_p12, %p956_p4  ;;  %s203_s12 = int_to_ptr.vmem [resolvable:$true] %s202_s12 }
  0x18   : > { %p632_p0 = scmp.ge.s32.totalorder %s885_s20, 1  ;;  %s189_s21 = scalar_lea.sflag [#allocation3], %s188_s5 }
  0x19   : > { %s887_s22 = smov 256   ;;  %s888_s24 = smov 16  }
  0x1a   : > { %p229_p1 = scmp.lt.s32.totalorder %s885_s20, 5  ;;  %s630_s26 = sshll.u32 %s188_s5, 1 }
  0x1b   : > { %s631_s6 = sshll.u32 %s881_s19, 1  ;;  %s216_s9 = scalar_lea.vmem [#allocation5], %s630_s26 }
  0x1c   : > { %s199_s10 = scalar_lea.hbm %s1093_s0, %s663_s7  ;;  %p230_p2 = pnand %p632_p0, %p229_p1 }
  0x1d   : > { %s200_s13 = sshll.u32 %s199_s10, 4  ;;  %s220_s25 = scalar_lea.hbm %s1084_s1, %s631_s6  ;;  %s201_s13 = int_to_ptr.hbm [resolvable:$true] %s200_s13 }
  0x1e   : > { %678 = dma.hbm_to_vmem [thread:$0]  (!%p985_p13), %s201_s13, 512, %s203_s12, %s189_s21, %s887_s22, %s887_s22, %s888_s24  }
  0x1f   : > { %s224_s10 = sshll.u32 %s216_s9, 4  ;;  %s222_s11 = sshll.u32 %s220_s25, 4  ;;  %s225_s10 = int_to_ptr.vmem [resolvable:$true] %s224_s10  ;;  %s223_s11 = int_to_ptr.hbm [resolvable:$true] %s222_s11 }
  0x20   : > { %s213_s0 = scalar_lea.sflag [#allocation6], %s188_s5  ;;  %233 = sbr.rel (%p230_p2) target bundleno = 313 (0x139), region = 28 }
  0x21   : > { %681 = dma.hbm_to_vmem [thread:$0]  (!%p985_p13), %s223_s11, 32, %s225_s10, %s213_s0  }
  0x22   : > { %s1000_s12 = sand.u32 (!%p230_p2), 1, %s869_s16  }
  0x23   : > { %s633_s13 = sshll.u32 (!%p230_p2), %s1000_s12, 5  ;;  %s236_s21 = scalar_lea.sflag (!%p230_p2), [#allocation3], %s1000_s12 }
  0x24   : > { %s239_s22 = scalar_lea.vmem (!%p230_p2), [#allocation2], %s633_s13 }
  0x25   : > { %852 = dma.done.wait (%p962_p8), %s236_s21, 512  }
  0x26   : > { %854 = vsyncadd (%p962_p8), %s236_s21, 4294966784  ;;  %s634_s5 = sshll.u32 %s1000_s12, 1  ;;  %s246_s0 = scalar_lea.sflag [#allocation6], %s1000_s12 }
  0x27   : > { %s249_s14 = scalar_lea.vmem [#allocation5], %s634_s5 }
  0x28   : > { %856 = dma.done.wait (%p962_p8), %s246_s0, 32  }
  0x29   : > { %858 = vsyncadd (%p962_p8), %s246_s0, 4294967264  ;;  %v640_v0 = vld [vmem:[%s239_s22] sm:$0xf]  ;;  %v666_v1 = vld [vmem:[%s239_s22 + $0xc] sm:$0xf0]  ;;  %vm331_vm0 = vcmask 130048  }
  0x2a   : > { %v664_v2 = vld [vmem:[%s239_s22 + $0x4] sm:$0xf]  ;;  %v641_v3 = vor.u32 %v666_v1, %v640_v0  ;;  %v642_v4 = vld [vmem:[%s239_s22 + $0x10] sm:$0xf0]  ;;  %v648_v5 = vld [vmem:[%s239_s22 + $0x8] sm:$0xf] }
  0x2b   : > { %v667_v6 = vld [vmem:[%s239_s22 + $0x14] sm:$0xf0]  ;;  %v645_v7 = vor.u32 %v664_v2, %v642_v4  ;;  %v665_v9 = vld [vmem:[%s239_s22 + $0xc] sm:$0xf]  ;;  %v650_v10 = vld [vmem:[%s239_s22 + $0x18] sm:$0xf0] }
  0x2c   : > { %v649_v8 = vor.u32 %v667_v6, %v648_v5  ;;  %342 = vmatpush.bf16.msra.mxu0 %v641_v3  ;;  %v653_v11 = vor.u32 %v665_v9, %v650_v10  ;;  %v306_v12 = vld [vmem:[%s249_s14] sm:$0x3]  ;;  %p290_p3 = scmp.lt.s32.totalorder %s877_s18, 3  ;;  %vm303_vm1 = vcmask 3072   ;;  %v889_v13 = vmov 0.0   ;;  %s635_s10 = sshll.u32 %s1000_s12, 3 }
  0x2d   : > { %355 = vmatpush.bf16.msra.mxu1 %v645_v7  ;;  %vm402_vm2 = vcmask 1043456   ;;  %s668_s11 = sshll.u32 %s877_s18, 3  ;;  %vm394_vm3 = vcmask 1041408   ;;  %vm398_vm4 = vcmask 1045508   ;;  %s275_s5 = scalar_lea.vmem [#allocation7], %s635_s10 }
  0x2e   : > { %368 = vmatpush.bf16.msra.mxu2 %v649_v8  ;;  %381 = vmatpush.bf16.msra.mxu3 %v653_v11  ;;  %s291_s27 = scalar_select %p290_p3, %s877_s18, 3 }
  0x2f   : > { %654 = vmatmul.msk.bf16.vlgmr.msra.gmra.mxu0 %vm331_vm0, %v306_v12  ;;  %s457_s22 = scalar_lea.hbm %s1085_s2, %s668_s11  ;;  %s459_s0 = sshll.u32 %s275_s5, 4  ;;  %s460_s0 = int_to_ptr.vmem [resolvable:$true] %s459_s0 }
  0x30   : > { %655 = vmatmul.msk.bf16.vlgmr.msra.gmra.mxu1 %vm331_vm0, %v306_v12  ;;  %s636_s24 = sshll.u32 %s291_s27, 2  ;;  %s461_s14 = sshll.u32 %s457_s22, 4  ;;  %s462_s14 = int_to_ptr.hbm [resolvable:$true] %s461_s14 }
  0x31   : > { %656 = vmatmul.msk.bf16.vlgmr.msra.gmra.mxu2 %vm331_vm0, %v306_v12  ;;  %657 = vmatmul.msk.bf16.vlgmr.msra.gmra.mxu3 %vm331_vm0, %v306_v12  ;;  %s1019_s7 = scalar_lea.vmem %s1086_s3, %s636_s24  ;;  %s1026_s9 = scalar_lea.vmem %s1087_s4, %s636_s24 }
  0x32   : > { %304 = vst.msk [vmem:[%s1019_s7] sm:$0xf] %vm303_vm1, %v889_v13  ;;  %s436_s18 = scalar_lea.sflag [#allocation4], %s1000_s12  ;;  %s813_s27 = sshra.s32 %s462_s14, 4  ;;  %s814_s27 = int_to_ptr.hbm [resolvable:$true] %s813_s27 }
  0x33   : > { %305 = vst.msk [vmem:[%s1026_s9] sm:$0xf] %vm303_vm1, %v889_v13  ;;  %s815_s24 = scalar_lea.hbm %s814_s27, 8  ;;  %s819_s8 = scalar_lea.hbm %s1085_s2, 32 }
  0x34   : > { %p816_p4 = scmp.ne.s32.totalorder %s814_s27, %s815_s24  ;;  %p820_p7 = scmp.lt.s32.totalorder %s814_s27, %s1085_s2 }
  0x35   : > { %p821_p8 = scmp.lt.s32.totalorder %s819_s8, %s815_s24 }
  0x36   : > { %p817_p5 = pnand %p816_p4, %p966_p9 }
  0x37   : > { %p822_p10 = por %p821_p8, %p820_p7 }
  0x38   : > { %p818_p6 = pneg %p817_p5 }
  0x3a   : > { %p823_p12 = pnand %p822_p10, %p818_p6 }
  0xac   : > { %v344_v14 = vpop.f32.mrf.mxu0 }
  0xad   : > { %v357_v15 = vpop.f32.mrf.mxu1  ;;  %v407_v16 = vsel %vm402_vm2, %v344_v14, 0.0  ;;  %v420_v18 = vmul.f32 %v344_v14, %v344_v14 }
  0xae   : > { %v408_v17 = vsel %vm402_vm2, %v357_v15, 0.0  ;;  %v421_v19 = vmul.f32 %v357_v15, %v357_v15  ;;  %v387_v20 = vpack.c.bf16 %v357_v15, %v344_v14 }
  0xaf   : > { %v409_v21 = vadd.f32 %v408_v17, %v407_v16  ;;  %v424_v23 = vsel %vm402_vm2, %v420_v18, 0.0 }
  0xb0   : > { %v425_v24 = vsel %vm402_vm2, %v421_v19, 0.0  ;;  %v391_v29 = vrot.slane %v387_v20, 2 }
  0xb1   : > { %v426_v37 = vadd.f32 %v425_v24, %v424_v23 }
  0xb2   : > { %v397_v40 = vsel %vm394_vm3, %v387_v20, %v391_v29 }
  0xb4   : > { %v370_v22 = vpop.f32.mrf.mxu2  ;;  %v383_v26 = vpop.f32.mrf.mxu3 }
  0xb5   : > { %v422_v25 = vmul.f32 %v370_v22, %v370_v22  ;;  %v346_v27 = vpop.f32.mrf.mxu0  ;;  %v410_v28 = vsel %vm402_vm2, %v370_v22, 0.0  ;;  %v388_v30 = vpack.c.bf16 %v383_v26, %v370_v22  ;;  %v359_v31 = vpop.f32.mrf.mxu1  ;;  %v412_v33 = vsel %vm402_vm2, %v383_v26, 0.0 }
  0xb6   : > { %v411_v32 = vadd.f32 %v410_v28, %v409_v21  ;;  %v423_v38 = vmul.f32 %v383_v26, %v383_v26 }
  0xb7   : > { %v392_v34 = vrot.slane %v388_v30, 4  ;;  %v393_v35 = vrot.slane %v388_v30, 6  ;;  %v427_v39 = vsel %vm402_vm2, %v422_v25, 0.0 }
  0xb8   : > { %v413_v36 = vadd.f32 %v412_v33, %v411_v32  ;;  %v428_v44 = vadd.f32 %v427_v39, %v426_v37  ;;  %v429_v46 = vsel %vm402_vm2, %v423_v38, 0.0 }
  0xb9   : > { %v401_v41 = vsel %vm398_vm4, %v392_v34, %v393_v35 }
  0xba   : > { %414 = vadd.xlane.f32.xlu0 %v413_v36  ;;  %v403_v42 = vsel %vm402_vm2, %v397_v40, %v401_v41 }
  0xbb   : > { %405 = vst [vmem:[%s275_s5] sm:$0xff] %v403_v42 }
  0xbc   : > { %v372_v43 = vpop.f32.mrf.mxu2  ;;  %v385_v45 = vpop.f32.mrf.mxu3 }
  0xbd   : > { %826 = shalt.err (!%p823_p12)
}
  0xbe   : > { %673 = dma.vmem_to_hbm [thread:$0]  (%p966_p9), %s460_s0, 128, %s462_s14, %s436_s18   ;;  %v430_v47 = vadd.f32 %v429_v46, %v428_v44  ;;  %v406_v48 = vld [vmem:[%s1019_s7] sm:$0xf] }
  0xbf   : > { %v419_v51 = vld [vmem:[%s1026_s9] sm:$0xf] }
  0xc2   : > { %431 = vadd.xlane.f32.xlu0 %v430_v47 }
 0x12d   : > { %v415_v49 = vpop.xlane.xlu0 %414 }
 0x12e   : > { %v416_v50 = vadd.f32 %v415_v49, %v406_v48 }
 0x130   : > { %418 = vst.msk [vmem:[%s1019_s7] sm:$0xf] %vm303_vm1, %v416_v50 }
 0x135   : > { %v432_v52 = vpop.xlane.xlu0 %431 }
 0x136   : > { %v433_v53 = vadd.f32 %v432_v52, %v419_v51 }
 0x138   : > { %434 = vst.msk [vmem:[%s1026_s9] sm:$0xf] %vm303_vm1, %v433_v53 }
 0x139 PF: > { %p687_p13 = scmp.ge.s32.totalorder %s885_s20, 2  ;;  %s479_s28 = sand.u32 1, %s865_s15  }
 0x13a   : > { %s480_s12 = scalar_lea.sflag [#allocation4], %s479_s28 }
 0x13b   : > { %p683_p9 = pnand %p687_p13, %p973_p11 }
 0x13d   : > { %p684_p0 = pneg %p683_p9 }
 0x13f   : > { %860 = dma.done.wait (%p684_p0), %s480_s12, 128  }
 0x140   : > { %862 = vsyncadd (%p684_p0), %s480_s12, 4294967168  ;;  %s24_s20 = sadd.s32 1, %s885_s20   ;;  %s1095_s15 = smov %s869_s16 }
 0x141   : > { %p21_p1 = scmp.ge.s32.totalorder %s24_s20, 6   ;;  %s1096_s16 = smov %s873_s17 }
 0x142   : > { %s1097_s17 = smov %s971_s29  ;;  %s1098_s18 = smov %s881_s19 }
 0x143   : > { %s1099_s19 = smov %s1101_s23  ;;  %23 = sbr.rel (!%p21_p1) target bundleno = 10 (0xa), region = 114 }
 0x148   :  { %500 = vsyncpa [#allocation3], 1 }
 0x149   :  { %502 = vsyncpa [#allocation3 + $0x1], 1 }
 0x14a   :  { %503 = vsyncpa [#allocation6], 1 }
 0x14b   :  { %505 = vsyncpa [#allocation6 + $0x1], 1 }
 0x14c   :  { %506 = vsyncpa [#allocation4], 1 }
 0x14d   :  { %508 = vsyncpa [#allocation4 + $0x1], 1 }

</bundles_post_ra>
